<compile_context>
chip_gen: v5e
topology: v5e:2x2
jax: 0.10.0
libtpu: 0.0.40
codegen_flags: <defaults>
</compile_context>

<pallas_src>
import math
import functools

import jax
import jax.numpy as jnp
from jax.experimental import pallas as pl
from jax.experimental.pallas import tpu as pltpu


def make_positional_encoding(max_len, emb_size):
    """Sinusoid PE buffer, identical to PositionalEncoding.__init__ (PyTorch)."""
    position = jnp.arange(0, max_len, dtype=jnp.float32)[:, None]          # (L, 1)
    div_term = jnp.exp(jnp.arange(0, emb_size, 2, dtype=jnp.float32)
                       * -(math.log(10000.0) / emb_size))                  # (E/2,)
    pe = jnp.zeros((max_len, emb_size), jnp.float32)
    pe = pe.at[:, 0::2].set(jnp.sin(position * div_term))
    pe = pe.at[:, 1::2].set(jnp.cos(position * div_term))
    return pe


# --------------------------------------------------------------------------
# Fast path: embedding table resident in VMEM (small/medium vocabularies).
# --------------------------------------------------------------------------
def _vmem_gather_kernel(ids_smem, pe_ref, table_ref, out_ref, rows_ref,
                        *, tq, seq_len, scale):
    """ids_smem: (B*S,) int32 SMEM; pe_ref: (TQ,E) VMEM; table_ref: (V,E) VMEM
    (fetched once, constant block index); out_ref: (TQ,E); rows_ref: (TQ,E) scratch."""
    s = pl.program_id(0)
    b = pl.program_id(1)
    base = b * seq_len + s * tq

    # In-VMEM dynamic row gather -- no DMA descriptors, no semaphores.
    for j in range(tq):
        row = ids_smem[base + j]
        rows_ref[pl.ds(j, 1), :] = table_ref[pl.ds(row, 1), :]

    # NormEmbeddings: * sqrt(E); PositionalEncoding: + pe (dropout = identity in eval).
    out_ref[...] = rows_ref[...].astype(jnp.float32) * scale + pe_ref[...]


# --------------------------------------------------------------------------
# Slow path: table stays in HBM, chunked + double-buffered row-gather DMAs.
# --------------------------------------------------------------------------
def _hbm_gather_kernel(ids_smem, pe_ref, emb_hbm, out_ref, rows_ref, sems,
                       *, tq, seq_len, scale, chunk):
    """emb_hbm: (V,E) in HBM (pl.ANY); sems: (2, chunk) DMA semaphores
    (double-buffered chunks, shared across the whole tile)."""
    s = pl.program_id(0)
    b = pl.program_id(1)
    base = b * seq_len + s * tq
    n_chunks = tq // chunk

    def issue_chunk(c, slot):
        descs = []
        for jj in range(chunk):
            j = c * chunk + jj
            row = ids_smem[base + j]
            d = pltpu.make_async_copy(
                emb_hbm.at[pl.ds(row, 1)],
                rows_ref.at[pl.ds(j, 1)],
                sems.at[slot, jj],
            )
            d.start()
            descs.append(d)
        return descs

    inflight = [None, None]
    inflight[0] = issue_chunk(0, 0)

    for c in range(n_chunks):
        slot = c & 1
        # Prefetch the next chunk's rows before waiting on this one.
        if c + 1 < n_chunks:
            inflight[1 - slot] = issue_chunk(c + 1, 1 - slot)
        # Wait on the descriptors that were actually started (no dummies).
        for d in inflight[slot]:
            d.wait()
        lo = c * chunk
        out_ref[pl.ds(lo, chunk), :] = (
            rows_ref[pl.ds(lo, chunk), :].astype(jnp.float32) * scale
            + pe_ref[pl.ds(lo, chunk), :])


def _choose_tile_tokens(seq_len, emb_size, dtype_bytes=4, target=128,
                        vmem_budget=24 << 20):
    """Largest multiple-of-8 divisor of seq_len within target and VMEM budget.

    Falls back to the full sequence (which always satisfies the BlockSpec
    full-dim rule) if no multiple-of-8 divisor exists.
    """
    # per-token working bytes: rows scratch + 2x PE tile + 2x out tile
    per_token = emb_size * (dtype_bytes + 4 * 4)
    cap = max(8, min(seq_len, target, vmem_budget // max(per_token, 1)))
    best = None
    for t in range(8, cap + 1, 8):
        if seq_len % t == 0:
            best = t
    return best if best is not None else seq_len


def transformer_embeddings(ids, emb_table, pe, *, tile_tokens=None,
                           force_hbm_gather=False):
    """ids: (B,S) int; emb_table: (V,E) f32; pe: (max_len,E) f32 -> (B,S,E) f32."""
    B, S = ids.shape
    V, E = emb_table.shape
    assert S <= pe.shape[0], "sequence longer than positional-encoding buffer"

    tq = tile_tokens if tile_tokens is not None else _choose_tile_tokens(S, E)
    assert S % tq == 0, "tile_tokens must divide the sequence length"

    # Ids drive addresses: clamp so out-of-range ids cannot read out of bounds.
    ids_flat = jnp.clip(ids.reshape(B * S), 0, V - 1).astype(jnp.int32)
    pe_s = pe[:S].astype(jnp.float32)                    # (S, E), shared across batch

    itemsize = emb_table.dtype.itemsize
    table_bytes = V * E * itemsize
    tile_bytes = tq * E * 4
    working_bytes = tq * E * itemsize + 4 * tile_bytes   # rows + 2xPE + 2xout

    use_vmem_table = (not force_hbm_gather) and (
        table_bytes + working_bytes <= (24 << 20))

    # Grid: token-tile axis leading (parallel, sharded on v7x megacore),
    # batch innermost (arbitrary) so the PE tile is fetched once per token tile.
    grid = (S // tq, B)
    pe_spec = pl.BlockSpec((tq, E), lambda s, b, ids: (s, 0))
    out_spec = pl.BlockSpec((None, tq, E), lambda s, b, ids: (b, s, 0))
    out_shape = jax.ShapeDtypeStruct((B, S, E), jnp.float32)

    if use_vmem_table:
        kernel = functools.partial(_vmem_gather_kernel,
                                   tq=tq, seq_len=S, scale=math.sqrt(E))
        # Full-array VMEM block with a constant index_map: DMA'd once, held.
        table_spec = pl.BlockSpec((V, E), lambda s, b, ids: (0, 0))
        scratch = [pltpu.VMEM((tq, E), emb_table.dtype)]
        need = table_bytes + working_bytes
    else:
        chunk = 8 if tq % 8 == 0 else tq
        kernel = functools.partial(_hbm_gather_kernel,
                                   tq=tq, seq_len=S, scale=math.sqrt(E),
                                   chunk=chunk)
        table_spec = pl.BlockSpec(memory_space=pl.ANY)   # table stays in HBM
        scratch = [pltpu.VMEM((tq, E), emb_table.dtype),
                   pltpu.SemaphoreType.DMA((2, chunk))]
        need = working_bytes

    vmem_limit = int(min(100 << 20, max(need + (8 << 20), 16 << 20)))

    out = pl.pallas_call(
        kernel,
        out_shape=out_shape,
        grid_spec=pltpu.PrefetchScalarGridSpec(
            num_scalar_prefetch=1,                       # ids -> SMEM
            grid=grid,
            in_specs=[pe_spec, table_spec],
            out_specs=out_spec,
            scratch_shapes=scratch,
        ),
        compiler_params=pltpu.CompilerParams(
            dimension_semantics=("parallel", "arbitrary"),
            vmem_limit_bytes=vmem_limit,
        ),
    )(ids_flat, pe_s, emb_table)

    # TODO(synk): training-mode dropout (pltpu.prng_random_bits mask) not implemented;
    # this matches the module in eval mode (nn.Dropout is identity).
    return out


if __name__ == "__main__":
    # Small, module-consistent shapes.
    ntokens, emb_size = 64, 32
    batch, seq = 2, 8
    max_len = 64
    pad_token = 0

    key = jax.random.PRNGKey(0)
    k_w, k_ids = jax.random.split(key)

    # nn.Embedding init: N(0, 1); padding_idx row zeroed.
    emb_table = jax.random.normal(k_w, (ntokens, emb_size), dtype=jnp.float32)
    emb_table = emb_table.at[pad_token].set(0.0)

    pe = make_positional_encoding(max_len, emb_size)
    ids = jax.random.randint(k_ids, (batch, seq), 0, ntokens, dtype=jnp.int32)

    # Pure-JAX reference (embedding lookup * sqrt(E) + pe, eval-mode dropout).
    ref = emb_table[ids] * math.sqrt(emb_size) + pe[None, :seq, :]

    # Fast path: VMEM-resident table.
    out_fast = jax.block_until_ready(transformer_embeddings(ids, emb_table, pe))
    assert out_fast.shape == (batch, seq, emb_size)
    assert jnp.allclose(out_fast, ref, atol=1e-5, rtol=1e-5)

    # Slow path (forced): HBM table with chunked, double-buffered DMA gather.
    out_slow = jax.block_until_ready(
        transformer_embeddings(ids, emb_table, pe, force_hbm_gather=True))
    assert jnp.allclose(out_slow, ref, atol=1e-5, rtol=1e-5)

    print("KERNEL_OK")
</pallas_src>

<mosaic_0001>
module attributes {stable_mosaic.version = 11 : i64} {
  func.func @_vmem_gather_kernel(%arg0: i32, %arg1: i32, %arg2: memref<16xi32, #tpu.memory_space<smem>>, %arg3: memref<8x32xf32, #tpu.memory_space<vmem>>, %arg4: memref<64x32xf32, #tpu.memory_space<vmem>>, %arg5: memref<1x8x32xf32, #tpu.memory_space<vmem>>, %arg6: memref<8x32xf32, #tpu.memory_space<vmem>>) attributes {dimension_semantics = [#tpu.dimension_semantics<parallel>, #tpu.dimension_semantics<arbitrary>], iteration_bounds = array<i64: 1, 2>, scalar_prefetch = 1 : i64, scratch_operands = 1 : i64, tpu.core_type = #tpu.core_type<tc>, window_params = [{transform_indices = @transform_0, window_bounds = array<i64: 8, 32>}, {pipeline_mode = #tpu.pipeline_mode<synchronous>, transform_indices = @transform_1, window_bounds = array<i64: 64, 32>}, {transform_indices = @transform_2, window_bounds = array<i64: 1, 8, 32>}]} {
    %c8_i32 = arith.constant 8 : i32
    %0 = arith.muli %arg1, %c8_i32 : i32
    %c8_i32_0 = arith.constant 8 : i32
    %1 = arith.muli %arg0, %c8_i32_0 : i32
    %2 = arith.addi %0, %1 : i32
    %c0_i32 = arith.constant 0 : i32
    %3 = arith.addi %2, %c0_i32 : i32
    %4 = arith.index_cast %3 : i32 to index
    %5 = memref.load %arg2[%4] : memref<16xi32, #tpu.memory_space<smem>>
    %6 = arith.index_cast %5 : i32 to index
    %c0 = arith.constant 0 : index
    %7 = vector.load %arg4[%6, %c0] : memref<64x32xf32, #tpu.memory_space<vmem>>, vector<1x32xf32>
    %c0_1 = arith.constant 0 : index
    %c0_2 = arith.constant 0 : index
    %8 = vector.load %arg6[%c0_1, %c0_2] : memref<8x32xf32, #tpu.memory_space<vmem>>, vector<1x32xf32>
    tpu.vector_store %arg6[%c0_1, %c0_2], %7 {strides = array<i32>} : memref<8x32xf32, #tpu.memory_space<vmem>>, vector<1x32xf32>,
    %c1_i32 = arith.constant 1 : i32
    %9 = arith.addi %2, %c1_i32 : i32
    %10 = arith.index_cast %9 : i32 to index
    %11 = memref.load %arg2[%10] : memref<16xi32, #tpu.memory_space<smem>>
    %12 = arith.index_cast %11 : i32 to index
    %c0_3 = arith.constant 0 : index
    %13 = vector.load %arg4[%12, %c0_3] : memref<64x32xf32, #tpu.memory_space<vmem>>, vector<1x32xf32>
    %c1 = arith.constant 1 : index
    %c0_4 = arith.constant 0 : index
    %14 = vector.load %arg6[%c1, %c0_4] : memref<8x32xf32, #tpu.memory_space<vmem>>, vector<1x32xf32>
    tpu.vector_store %arg6[%c1, %c0_4], %13 {strides = array<i32>} : memref<8x32xf32, #tpu.memory_space<vmem>>, vector<1x32xf32>,
    %c2_i32 = arith.constant 2 : i32
    %15 = arith.addi %2, %c2_i32 : i32
    %16 = arith.index_cast %15 : i32 to index
    %17 = memref.load %arg2[%16] : memref<16xi32, #tpu.memory_space<smem>>
    %18 = arith.index_cast %17 : i32 to index
    %c0_5 = arith.constant 0 : index
    %19 = vector.load %arg4[%18, %c0_5] : memref<64x32xf32, #tpu.memory_space<vmem>>, vector<1x32xf32>
    %c2 = arith.constant 2 : index
    %c0_6 = arith.constant 0 : index
    %20 = vector.load %arg6[%c2, %c0_6] : memref<8x32xf32, #tpu.memory_space<vmem>>, vector<1x32xf32>
    tpu.vector_store %arg6[%c2, %c0_6], %19 {strides = array<i32>} : memref<8x32xf32, #tpu.memory_space<vmem>>, vector<1x32xf32>,
    %c3_i32 = arith.constant 3 : i32
    %21 = arith.addi %2, %c3_i32 : i32
    %22 = arith.index_cast %21 : i32 to index
    %23 = memref.load %arg2[%22] : memref<16xi32, #tpu.memory_space<smem>>
    %24 = arith.index_cast %23 : i32 to index
    %c0_7 = arith.constant 0 : index
    %25 = vector.load %arg4[%24, %c0_7] : memref<64x32xf32, #tpu.memory_space<vmem>>, vector<1x32xf32>
    %c3 = arith.constant 3 : index
    %c0_8 = arith.constant 0 : index
    %26 = vector.load %arg6[%c3, %c0_8] : memref<8x32xf32, #tpu.memory_space<vmem>>, vector<1x32xf32>
    tpu.vector_store %arg6[%c3, %c0_8], %25 {strides = array<i32>} : memref<8x32xf32, #tpu.memory_space<vmem>>, vector<1x32xf32>,
    %c4_i32 = arith.constant 4 : i32
    %27 = arith.addi %2, %c4_i32 : i32
    %28 = arith.index_cast %27 : i32 to index
    %29 = memref.load %arg2[%28] : memref<16xi32, #tpu.memory_space<smem>>
    %30 = arith.index_cast %29 : i32 to index
    %c0_9 = arith.constant 0 : index
    %31 = vector.load %arg4[%30, %c0_9] : memref<64x32xf32, #tpu.memory_space<vmem>>, vector<1x32xf32>
    %c4 = arith.constant 4 : index
    %c0_10 = arith.constant 0 : index
    %32 = vector.load %arg6[%c4, %c0_10] : memref<8x32xf32, #tpu.memory_space<vmem>>, vector<1x32xf32>
    tpu.vector_store %arg6[%c4, %c0_10], %31 {strides = array<i32>} : memref<8x32xf32, #tpu.memory_space<vmem>>, vector<1x32xf32>,
    %c5_i32 = arith.constant 5 : i32
    %33 = arith.addi %2, %c5_i32 : i32
    %34 = arith.index_cast %33 : i32 to index
    %35 = memref.load %arg2[%34] : memref<16xi32, #tpu.memory_space<smem>>
    %36 = arith.index_cast %35 : i32 to index
    %c0_11 = arith.constant 0 : index
    %37 = vector.load %arg4[%36, %c0_11] : memref<64x32xf32, #tpu.memory_space<vmem>>, vector<1x32xf32>
    %c5 = arith.constant 5 : index
    %c0_12 = arith.constant 0 : index
    %38 = vector.load %arg6[%c5, %c0_12] : memref<8x32xf32, #tpu.memory_space<vmem>>, vector<1x32xf32>
    tpu.vector_store %arg6[%c5, %c0_12], %37 {strides = array<i32>} : memref<8x32xf32, #tpu.memory_space<vmem>>, vector<1x32xf32>,
    %c6_i32 = arith.constant 6 : i32
    %39 = arith.addi %2, %c6_i32 : i32
    %40 = arith.index_cast %39 : i32 to index
    %41 = memref.load %arg2[%40] : memref<16xi32, #tpu.memory_space<smem>>
    %42 = arith.index_cast %41 : i32 to index
    %c0_13 = arith.constant 0 : index
    %43 = vector.load %arg4[%42, %c0_13] : memref<64x32xf32, #tpu.memory_space<vmem>>, vector<1x32xf32>
    %c6 = arith.constant 6 : index
    %c0_14 = arith.constant 0 : index
    %44 = vector.load %arg6[%c6, %c0_14] : memref<8x32xf32, #tpu.memory_space<vmem>>, vector<1x32xf32>
    tpu.vector_store %arg6[%c6, %c0_14], %43 {strides = array<i32>} : memref<8x32xf32, #tpu.memory_space<vmem>>, vector<1x32xf32>,
    %c7_i32 = arith.constant 7 : i32
    %45 = arith.addi %2, %c7_i32 : i32
    %46 = arith.index_cast %45 : i32 to index
    %47 = memref.load %arg2[%46] : memref<16xi32, #tpu.memory_space<smem>>
    %48 = arith.index_cast %47 : i32 to index
    %c0_15 = arith.constant 0 : index
    %49 = vector.load %arg4[%48, %c0_15] : memref<64x32xf32, #tpu.memory_space<vmem>>, vector<1x32xf32>
    %c7 = arith.constant 7 : index
    %c0_16 = arith.constant 0 : index
    %50 = vector.load %arg6[%c7, %c0_16] : memref<8x32xf32, #tpu.memory_space<vmem>>, vector<1x32xf32>
    tpu.vector_store %arg6[%c7, %c0_16], %49 {strides = array<i32>} : memref<8x32xf32, #tpu.memory_space<vmem>>, vector<1x32xf32>,
    %c0_17 = arith.constant 0 : index
    %c0_18 = arith.constant 0 : index
    %51 = vector.load %arg6[%c0_17, %c0_18] : memref<8x32xf32, #tpu.memory_space<vmem>>, vector<8x32xf32>
    %cst = arith.constant 5.65685415 : f32
    %52 = vector.broadcast %cst : f32 to vector<8x32xf32>
    %53 = arith.mulf %51, %52 : vector<8x32xf32>
    %c0_19 = arith.constant 0 : index
    %c0_20 = arith.constant 0 : index
    %54 = vector.load %arg3[%c0_19, %c0_20] : memref<8x32xf32, #tpu.memory_space<vmem>>, vector<8x32xf32>
    %55 = arith.addf %53, %54 : vector<8x32xf32>
    %c0_21 = arith.constant 0 : index
    %c0_22 = arith.constant 0 : index
    %c0_23 = arith.constant 0 : index
    %56 = vector.load %arg5[%c0_21, %c0_22, %c0_23] : memref<1x8x32xf32, #tpu.memory_space<vmem>>, vector<1x8x32xf32>
    %57 = vector.shape_cast %56 : vector<1x8x32xf32> to vector<8x32xf32>
    %58 = vector.shape_cast %55 : vector<8x32xf32> to vector<1x8x32xf32>
    tpu.vector_store %arg5[%c0_21, %c0_22, %c0_23], %58 {strides = array<i32>} : memref<1x8x32xf32, #tpu.memory_space<vmem>>, vector<1x8x32xf32>,
    return
  }
  func.func @transform_0(%arg0: i32, %arg1: i32, %arg2: memref<16xi32, #tpu.memory_space<smem>>) -> (i32, i32) {
    %c0_i32 = arith.constant 0 : i32
    %c0_i32_0 = arith.constant 0 : i32
    return %arg0, %c0_i32 : i32, i32
  }
  func.func @transform_1(%arg0: i32, %arg1: i32, %arg2: memref<16xi32, #tpu.memory_space<smem>>) -> (i32, i32) {
    %c0_i32 = arith.constant 0 : i32
    %c0_i32_0 = arith.constant 0 : i32
    %c0_i32_1 = arith.constant 0 : i32
    return %c0_i32, %c0_i32_0 : i32, i32
  }
  func.func @transform_2(%arg0: i32, %arg1: i32, %arg2: memref<16xi32, #tpu.memory_space<smem>>) -> (i32, i32, i32) {
    %c0_i32 = arith.constant 0 : i32
    %c0_i32_0 = arith.constant 0 : i32
    return %arg1, %arg0, %c0_i32 : i32, i32, i32
  }
}

</mosaic_0001>

<bundles_post_ra>
// kernel: tpu_custom_call.1
= control target key start
LH: loop header
LB: loop body
LE: loop exit
PB: predicated region body
PF: predicated region fallthrough
CT: control target
= control target key end

     0   :  { %s468_s15 = smov [#allocation4]   ;;  %s627_s0 = inlined_call_operand.vmem [shape: s32[16], index: 0, kind: input, shape index: {}]   ;;  %s628_s1 = inlined_call_operand.vmem [shape: f32[8,32], index: 1, kind: input, shape index: {}]   ;;  %s629_s2 = inlined_call_operand.vmem [shape: f32[64,32], index: 2, kind: input, shape index: {}]   ;;  %s630_s3 = inlined_call_operand.hbm [shape: f32[2,8,32], index: 3, kind: output, shape index: {}]  }
   0x1   :  { %s9_s14 = sshll.u32 %s627_s0, 4  ;;  %s10_s14 = int_to_ptr.vmem [resolvable:$true] %s9_s14 }
   0x2   :  { %12 = dma.vmem_to_smem %s10_s14, 16, %s468_s15, [#allocation3] }
   0x3   :  { %438 = dma.done.wait [#allocation3], 16 }
   0x4   :  { %439 = vsyncadd [#allocation3], 4294967280 }
   0x5   :  { %15 = sfence }
   0x6   :  { %16 = vsyncpa [#allocation6], 0 }
   0x7   :  { %18 = vsyncpa [#allocation6 + $0x1], 0  ;;  %s492_s16 = smov 0   ;;  %s494_s17 = smov 0  }
   0x8   :  { %s496_s18 = smov 0   ;;  %s498_s19 = smov 0  }
   0x9   :  { %s500_s20 = smov 0   ;;  %s502_s21 = smov 0  }
   0xa LB: > { %s307_s0 = sadd.s32 4294967295, %s466_s21   ;;  %s308_s22 = sadd.s32 4294967294, %s466_s21   ;;  %s466_s21 = sphi %s502_s21, %s24_s21   ;;  %s462_s20 = sphi %s500_s20, %s640_s20   ;;  %s458_s19 = sphi %s498_s19, %s639_s19   ;;  %s454_s18 = sphi %s496_s18, %s638_s18   ;;  %s450_s17 = sphi %s494_s17, %s637_s17   ;;  %s446_s16 = sphi %s492_s16, %s636_s16  }
   0xb   : > { %s33_s23 = sadd.s32 1, %s462_s20  ;;  %s92_s24 = sadd.s32 1, %s454_s18 }
   0xc   : > { %p34_p0 = scmp.ge.s32.totalorder %s33_s23, 2  ;;  %p102_p1 = scmp.ne.s32.totalorder %s454_s18, %s450_s17 }
   0xd   : > { %p103_p2 = scmp.eq.s32.totalorder %s307_s0, 1  ;;  %p108_p3 = scmp.ne.s32.totalorder %s450_s17, %s446_s16 }
   0xe   : > { %s642_s23 = smov (%p34_p0, %s33_s23), 0  ;;  %p109_p5 = scmp.eq.s32.totalorder %s308_s22, 1 }
   0xf   : > { %632 = sst [smem:[#allocation9_spill]] %s642_s23  ;;  %p530_p4 = por %p103_p2, %p102_p1 }
  0x10   : > { %s87_s26 = ssub.s32 %s462_s20, %s642_s23  ;;  %p311_p6 = scmp.ge.s32.totalorder %s466_s21, 1 }
  0x11   : > { %p90_p7 = scmp.eq.s32.totalorder %s87_s26, 0  ;;  %p537_p8 = por %p109_p5, %p108_p3 }
  0x12   : > { %p137_p9 = scmp.lt.s32.totalorder %s466_s21, 3 }
  0x13   : > { %s543_s28 = scalar_select %p90_p7, %s454_s18, %s92_s24  }
  0x14   : > { %p138_p10 = pnand %p311_p6, %p137_p9 }
  0x15   : > { %s545_s29 = sshll.u32 (!%p138_p10), %s458_s19, 3 }
  0x16   : > { %141 = sbr.rel (%p138_p10) target bundleno = 53 (0x35), region = 28  ;;  %s165_s30 = sld [smem:[#allocation4 + %s545_s29]] (!%p138_p10) }
  0x17   : > { %s170_s4 = sadd.s32 (!%p138_p10), 1, %s545_s29  ;;  %s175_s6 = sadd.s32 (!%p138_p10), 2, %s545_s29 }
  0x18   : > { %s171_s5 = sld [smem:[#allocation4 + %s170_s4]] (!%p138_p10)  ;;  %s180_s8 = sadd.s32 (!%p138_p10), 3, %s545_s29 }
  0x19   : > { %s176_s7 = sld [smem:[#allocation4 + %s175_s6]] (!%p138_p10)  ;;  %s185_s10 = sadd.s32 (!%p138_p10), 4, %s545_s29 }
  0x1a   : > { %s181_s9 = sld [smem:[#allocation4 + %s180_s8]] (!%p138_p10)  ;;  %s190_s12 = sadd.s32 (!%p138_p10), 5, %s545_s29 }
  0x1b   : > { %s186_s11 = sld [smem:[#allocation4 + %s185_s10]]  ;;  %vm168_vm0 = vcmask 253952   ;;  %s195_s14 = sadd.s32 6, %s545_s29  ;;  %v207_v9 = vld [vmem:[%s628_s1] sm:$0xff]  ;;  %vm209_vm1 = vcmask 261120  }
  0x1c   : > { %s191_s13 = sld [smem:[#allocation4 + %s190_s12]]  ;;  %s166_s0 = scalar_lea.vmem %s629_s2, %s165_s30 }
  0x1d   : > { %s196_s22 = sld [smem:[#allocation4 + %s195_s14]]  ;;  %v167_v0 = vld [vmem:[%s166_s0] sm:$0x1]  ;;  %s200_s23 = sadd.s32 7, %s545_s29 }
  0x1e   : > { %s172_s4 = scalar_lea.vmem %s629_s2, %s171_s5  ;;  %169 = vst.msk [vmem:[#allocation2] sm:$0x1] %vm168_vm0, %v167_v0  ;;  %s201_s12 = sld [smem:[#allocation4 + %s200_s23]] }
  0x1f   : > { %v173_v1 = vld [vmem:[%s172_s4] sm:$0x1]  ;;  %s177_s10 = scalar_lea.vmem %s629_s2, %s176_s7  ;;  %s155_s6 = sand.u32 1, %s450_s17  }
  0x20   : > { %174 = vst.msk [vmem:[#allocation2 + $0x1] sm:$0x1] %vm168_vm0, %v173_v1  ;;  %v178_v2 = vld [vmem:[%s177_s10] sm:$0x1]  ;;  %s182_s15 = scalar_lea.vmem %s629_s2, %s181_s9  ;;  %s406_s9 = scalar_lea.hbm %s630_s3, 16 }
  0x21   : > { %179 = vst.msk [vmem:[#allocation2 + $0x2] sm:$0x1] %vm168_vm0, %v178_v2  ;;  %v183_v3 = vld [vmem:[%s182_s15] sm:$0x1]  ;;  %s187_s0 = scalar_lea.vmem %s629_s2, %s186_s11  ;;  %s223_s15 = scalar_lea.hbm %s630_s3, %s545_s29 }
  0x22   : > { %184 = vst.msk [vmem:[#allocation2 + $0x3] sm:$0x1] %vm168_vm0, %v183_v3  ;;  %v188_v4 = vld [vmem:[%s187_s0] sm:$0x1]  ;;  %s192_s24 = scalar_lea.vmem %s629_s2, %s191_s13  ;;  %s312_s13 = sshll.u32 %s155_s6, 3 }
  0x23   : > { %189 = vst.msk [vmem:[#allocation2 + $0x4] sm:$0x1] %vm168_vm0, %v188_v4  ;;  %v193_v5 = vld [vmem:[%s192_s24] sm:$0x1]  ;;  %s197_s4 = scalar_lea.vmem %s629_s2, %s196_s22  ;;  %s157_s5 = scalar_lea.vmem [#allocation5], %s312_s13 }
  0x24   : > { %194 = vst.msk [vmem:[#allocation2 + $0x5] sm:$0x1] %vm168_vm0, %v193_v5  ;;  %v198_v6 = vld [vmem:[%s197_s4] sm:$0x1]  ;;  %s202_s10 = scalar_lea.vmem %s629_s2, %s201_s12  ;;  %s225_s22 = sshll.u32 %s157_s5, 4  ;;  %s226_s22 = int_to_ptr.vmem [resolvable:$true] %s225_s22 }
  0x25   : > { %199 = vst.msk [vmem:[#allocation2 + $0x6] sm:$0x1] %vm168_vm0, %v198_v6  ;;  %v203_v7 = vld [vmem:[%s202_s10] sm:$0x1]  ;;  %s227_s7 = sshll.u32 %s223_s15, 4  ;;  %s212_s12 = scalar_lea.sflag [#allocation6], %s155_s6  ;;  %s228_s7 = int_to_ptr.hbm [resolvable:$true] %s227_s7 }
  0x26   : > { %204 = vst.msk [vmem:[#allocation2 + $0x7] sm:$0x1] %vm168_vm0, %v203_v7  ;;  %s400_s23 = sshra.s32 %s228_s7, 4  ;;  %s401_s23 = int_to_ptr.hbm [resolvable:$true] %s400_s23 }
  0x27   : > { %s402_s24 = scalar_lea.hbm %s401_s23, 8  ;;  %p407_p0 = scmp.lt.s32.totalorder %s401_s23, %s630_s3 }
  0x28   : > { %p403_p11 = scmp.ne.s32.totalorder %s401_s23, %s402_s24  ;;  %p408_p1 = scmp.lt.s32.totalorder %s406_s9, %s402_s24 }
  0x2a   : > { %p404_p12 = pnand %p403_p11, %p530_p4  ;;  %p409_p2 = por %p408_p1, %p407_p0 }
  0x2c   : > { %p405_p13 = pneg %p404_p12 }
  0x2d   : > { %v205_v8 = vld [vmem:[#allocation2] sm:$0xff] }
  0x2e   : > { %v206_v10 = vmul.f32 5.656854, %v205_v8  ;;  %p410_p3 = pnand %p409_p2, %p405_p13 }
  0x30   : > { %v208_v11 = vadd.f32 %v207_v9, %v206_v10 }
  0x32   : > { %210 = vst.msk [vmem:[%s157_s5] sm:$0xff] %vm209_vm1, %v208_v11 }
  0x33   : > { %413 = shalt.err (!%p410_p3)
}
  0x34   : > { %318 = dma.vmem_to_hbm [thread:$0]  (%p530_p4), %s226_s22, 128, %s228_s7, %s212_s12  }
  0x35 PF: > { %p324_p5 = scmp.ge.s32.totalorder %s466_s21, 2  ;;  %s239_s6 = sand.u32 1, %s446_s16  }
  0x36   : > { %s240_s8 = scalar_lea.sflag [#allocation6], %s239_s6 }
  0x37   : > { %p321_p6 = pnand %p324_p5, %p537_p8 }
  0x39   : > { %p322_p7 = pneg %p321_p6 }
  0x3b   : > { %441 = dma.done.wait (%p322_p7), %s240_s8, 128  }
  0x3c   : > { %443 = vsyncadd (%p322_p7), %s240_s8, 4294967168  ;;  %s24_s21 = sadd.s32 1, %s466_s21   ;;  %s635_s25 = sld [smem:[#allocation9_spill]] }
  0x3d   : > { %p21_p9 = scmp.ge.s32.totalorder %s24_s21, 4   ;;  %s636_s16 = smov %s450_s17 }
  0x3e   : > { %s637_s17 = smov %s454_s18  ;;  %s638_s18 = smov %s543_s28 }
  0x3f   : > { %s639_s19 = smov %s462_s20  ;;  %23 = sbr.rel (!%p21_p9) target bundleno = 10 (0xa), region = 71 }
  0x42   : > { %s640_s20 = smov %s635_s25 }
  0x44   :  { %246 = vsyncpa [#allocation6], 1 }
  0x45   :  { %248 = vsyncpa [#allocation6 + $0x1], 1 }

</bundles_post_ra>
